<compile_context>
chip_gen: v5e
topology: v5e:2x2
jax: 0.10.0
libtpu: 0.0.40
codegen_flags: <defaults>
</compile_context>

<pallas_src>
import functools

import jax
import jax.numpy as jnp
from jax.experimental import pallas as pl
from jax.experimental.pallas import tpu as pltpu

LANE = 128      # lane width: feature axes are padded to this for dense vst / full MXU cols
SUBLANE = 8     # node axis padded to a multiple of this


# ----------------------------------------------------------------------------
# Fused Pallas kernel: all NiN layers + prediction head in one call
# ----------------------------------------------------------------------------
def fused_graphconv_kernel(x_ref, adj_ref, w1_ref, b1_ref, w2a_ref, w2b_ref, b2_ref,
                           gnw_ref, gnb_ref, gnms_ref, pw_ref, pb_ref,
                           o_ref, *, num_layers, num_nodes):
    """For each layer l:
         h   = ELU(emb @ W1[l] + b1[l])                  (bf16 MXU, f32 acc, f32 elementwise)
         h   = A @ h                                     (bf16 MXU, f32 acc)
         h   = GraphNorm(h)                              (mean/var over node axis, f32)
         emb = h @ W2a[l] + emb @ W2b[l] + b2[l]         (split-K skip connection, no concat)
       then out = emb @ Wp + bp.
    """
    n_pad = x_ref.shape[0]
    inv_n = 1.0 / float(num_nodes)

    adj = adj_ref[...]                                   # (Np, Np) bf16, resident all layers

    # Row-validity mask only needed if the node axis was padded (padded rows must not
    # contribute to the GraphNorm variance).  Do NOT drop this in a tiled refactor.
    if n_pad > num_nodes:
        row_ids = jax.lax.broadcasted_iota(jnp.int32, (n_pad, 1), 0)
        valid = (row_ids < num_nodes).astype(jnp.float32)
    else:
        valid = None

    emb = x_ref[...]                                     # (Np, Cp) bf16 input, stays on-chip

    for l in range(num_layers):                          # static unroll (small L)
        # single bf16 cast of the layer input, reused by linear1 and the skip matmul
        # (first layer: emb is already bf16, astype is a no-op)
        emb_bf = emb.astype(jnp.bfloat16)

        # linear1 + ELU (alpha=1); exp only on the clamped-negative branch
        h = jnp.dot(emb_bf, w1_ref[l],
                    preferred_element_type=jnp.float32) + b1_ref[l]
        h = jnp.where(h > 0, h, jnp.exp(jnp.minimum(h, 0.0)) - 1.0)

        # adjacency aggregation A @ h on the MXU (padded rows/cols of A are zero)
        h = jnp.dot(adj, h.astype(jnp.bfloat16),
                    preferred_element_type=jnp.float32)  # (Np, Cp) f32

        # GraphNorm over the node axis, per feature (padded rows of h are already zero)
        mean = jnp.sum(h, axis=0, keepdims=True) * inv_n            # (1, Cp)
        cen = h - mean * gnms_ref[l]
        if valid is not None:
            cen = cen * valid
        var = jnp.sum(cen * cen, axis=0, keepdims=True) * inv_n
        h = gnw_ref[l] * cen * jax.lax.rsqrt(var + 1e-5) + gnb_ref[l]

        # TODO(synk): F.dropout(p=0.2, training=True) is stochastic; eval-mode identity here.

        # linear2 on cat([h, x1], -1) implemented as two K=Cp matmuls accumulated in f32
        # (no (Np, 2*Cp) concat materialization); h cast to bf16 exactly once.
        h_bf = h.astype(jnp.bfloat16)
        emb = (jnp.dot(h_bf, w2a_ref[l], preferred_element_type=jnp.float32)
               + jnp.dot(emb_bf, w2b_ref[l], preferred_element_type=jnp.float32)
               + b2_ref[l])                              # (Np, Cp) f32

    # prediction head (output lane-padded to 128 -> unmasked, lane-dense stores)
    o_ref[...] = (jnp.dot(emb.astype(jnp.bfloat16), pw_ref[...],
                          preferred_element_type=jnp.float32) + pb_ref[...])


# ----------------------------------------------------------------------------
# Wrapper (glue: single pallas_call for the whole model)
# ----------------------------------------------------------------------------
def _vmem_spec():
    return pl.BlockSpec(memory_space=pltpu.MemorySpace.VMEM)


def _nbytes(shape, dtype):
    n = 1
    for s in shape:
        n *= int(s)
    return n * jnp.dtype(dtype).itemsize


@functools.partial(jax.jit, static_argnames=("num_nodes", "num_layers", "out_channels"))
def graphconv_forward(x_pad, adj, params, *, num_nodes, num_layers, out_channels):
    n_pad, c_pad = x_pad.shape
    o_pad = params["pred_w"].shape[1]
    args = (x_pad, adj, params["w1"], params["b1"], params["w2a"], params["w2b"],
            params["b2"], params["gn_w"], params["gn_b"], params["gn_ms"],
            params["pred_w"], params["pred_b"])

    # Explicit VMEM budget: resident args/out (+double-buffer slack) + activation working
    # set + headroom.  Clamped to 64 MiB so the same value is legal on v7x; on v5e/v6e the
    # limit can be raised toward 128 MiB for larger graphs before switching to the tiled
    # path (see TODOs above).
    resident = sum(_nbytes(a.shape, a.dtype) for a in args) + _nbytes((n_pad, o_pad), jnp.float32)
    act_working = 8 * _nbytes((n_pad, c_pad), jnp.float32)
    vmem_budget = 2 * resident + act_working + (2 << 20)
    vmem_limit = min(max(int(vmem_budget), 16 << 20), 64 << 20)

    out_pad = pl.pallas_call(
        functools.partial(fused_graphconv_kernel,
                          num_layers=num_layers, num_nodes=num_nodes),
        out_shape=jax.ShapeDtypeStruct((n_pad, o_pad), jnp.float32),
        in_specs=[_vmem_spec() for _ in args],
        out_specs=_vmem_spec(),
        compiler_params=pltpu.CompilerParams(vmem_limit_bytes=vmem_limit),
    )(*args)
    return out_pad[:num_nodes, :out_channels]


def build_adjacency(edge_index, num_nodes, n_pad):
    """Densify COO adjacency once (duplicates summed, matching sparse coalescing).
    Values are small integer counts -> exactly representable in bf16 up to 256."""
    w = jnp.ones((edge_index.shape[1],), jnp.float32)
    adj = jnp.zeros((n_pad, n_pad), jnp.float32).at[
        edge_index[0], edge_index[1]].add(w)
    # bf16 holds integer counts exactly only up to 256; guard before the cast.
    assert float(jnp.max(adj)) <= 256.0, "duplicate-edge count exceeds bf16 exact range"
    return adj.astype(jnp.bfloat16)


# ----------------------------------------------------------------------------
# Parameter init (deterministic; mirrors module __init__ shapes, zero-padded to 128 lanes)
# ----------------------------------------------------------------------------
def glorot(key, fan_in, fan_out):
    a = jnp.sqrt(6.0 / (fan_in + fan_out))
    return jax.random.uniform(key, (fan_in, fan_out), jnp.float32, -a, a)


def init_graphconv_params(key, num_layers, hidden_channels, out_channels, c_pad=LANE):
    C, Cp = hidden_channels, c_pad
    o_pad = c_pad  # prediction output lane-padded too
    w1s, b1s, w2as, w2bs, b2s, gws, gbs, gms = [], [], [], [], [], [], [], []
    for _ in range(num_layers):
        key, k1, k2 = jax.random.split(key, 3)
        w1 = glorot(k1, C, C)
        w2 = glorot(k2, 2 * C, C)                     # linear2: in = C (agg) + C (skip x1)
        w1p = jnp.zeros((Cp, Cp), jnp.float32).at[:C, :C].set(w1)
        # split W2 into the block that multiplies the normalized/aggregated h (rows 0:C)
        # and the block that multiplies the skip input x1 (rows C:2C)
        w2ap = jnp.zeros((Cp, Cp), jnp.float32).at[:C, :C].set(w2[:C])
        w2bp = jnp.zeros((Cp, Cp), jnp.float32).at[:C, :C].set(w2[C:])
        w1s.append(w1p.astype(jnp.bfloat16))
        w2as.append(w2ap.astype(jnp.bfloat16))
        w2bs.append(w2bp.astype(jnp.bfloat16))
        b1s.append(jnp.zeros((1, Cp), jnp.float32))
        b2s.append(jnp.zeros((1, Cp), jnp.float32))
        gws.append(jnp.zeros((1, Cp), jnp.float32).at[:, :C].set(1.0))   # GraphNorm weight
        gbs.append(jnp.zeros((1, Cp), jnp.float32))                      # GraphNorm bias
        gms.append(jnp.zeros((1, Cp), jnp.float32).at[:, :C].set(1.0))   # GraphNorm mean_scale
    key, kp = jax.random.split(key)
    bound = 1.0 / (hidden_channels ** 0.5)
    pw = jax.random.uniform(kp, (C, out_channels), jnp.float32, -bound, bound)
    pred_w = jnp.zeros((Cp, o_pad), jnp.float32).at[:C, :out_channels].set(pw)
    return dict(
        w1=jnp.stack(w1s), b1=jnp.stack(b1s),
        w2a=jnp.stack(w2as), w2b=jnp.stack(w2bs), b2=jnp.stack(b2s),
        gn_w=jnp.stack(gws), gn_b=jnp.stack(gbs), gn_ms=jnp.stack(gms),
        pred_w=pred_w.astype(jnp.bfloat16),
        pred_b=jnp.zeros((1, o_pad), jnp.float32),
    )


if __name__ == "__main__":
    num_layers = 2
    hidden_channels = 32
    out_channels = 8
    num_nodes = 16
    num_edges = 48

    n_pad = ((num_nodes + SUBLANE - 1) // SUBLANE) * SUBLANE

    key = jax.random.PRNGKey(0)
    key, kx, ke, kp = jax.random.split(key, 4)

    x = jax.random.normal(kx, (num_nodes, hidden_channels), jnp.float32)
    edge_index = jax.random.randint(ke, (2, num_edges), 0, num_nodes, jnp.int32)

    params = init_graphconv_params(kp, num_layers, hidden_channels, out_channels)

    # Padded, lane-dense inputs.  x ships as bf16 (it is cast to bf16 before every MXU use
    # anyway); adjacency built ONCE (not per forward).
    # TODO(synk): with >1 graph, batch graphs along the node (M) axis (block-diagonal A or
    #             a per-graph grid axis) to fill MXU rows; keep GraphNorm per-graph.
    x_pad = jnp.zeros((n_pad, LANE), jnp.bfloat16).at[
        :num_nodes, :hidden_channels].set(x.astype(jnp.bfloat16))
    adj = build_adjacency(edge_index, num_nodes, n_pad)

    out = graphconv_forward(x_pad, adj, params,
                            num_nodes=num_nodes, num_layers=num_layers,
                            out_channels=out_channels)
    out = jax.block_until_ready(out)
    assert out.shape == (num_nodes, out_channels)
    assert out.dtype == jnp.float32
    print("KERNEL_OK")
</pallas_src>

<mosaic_0001>
module attributes {stable_mosaic.version = 11 : i64} {
  func.func @fused_graphconv_kernel(%arg0: memref<16x128xbf16, #tpu.memory_space<vmem>>, %arg1: memref<16x16xbf16, #tpu.memory_space<vmem>>, %arg2: memref<2x128x128xbf16, #tpu.memory_space<vmem>>, %arg3: memref<2x1x128xf32, #tpu.memory_space<vmem>>, %arg4: memref<2x128x128xbf16, #tpu.memory_space<vmem>>, %arg5: memref<2x128x128xbf16, #tpu.memory_space<vmem>>, %arg6: memref<2x1x128xf32, #tpu.memory_space<vmem>>, %arg7: memref<2x1x128xf32, #tpu.memory_space<vmem>>, %arg8: memref<2x1x128xf32, #tpu.memory_space<vmem>>, %arg9: memref<2x1x128xf32, #tpu.memory_space<vmem>>, %arg10: memref<128x128xbf16, #tpu.memory_space<vmem>>, %arg11: memref<1x128xf32, #tpu.memory_space<vmem>>, %arg12: memref<16x128xf32, #tpu.memory_space<vmem>>) attributes {dimension_semantics = [], scalar_prefetch = 0 : i64, scratch_operands = 0 : i64, tpu.core_type = #tpu.core_type<tc>} {
    %c0 = arith.constant 0 : index
    %c0_0 = arith.constant 0 : index
    %0 = vector.load %arg1[%c0, %c0_0] : memref<16x16xbf16, #tpu.memory_space<vmem>>, vector<16x16xbf16>
    %c0_1 = arith.constant 0 : index
    %c0_2 = arith.constant 0 : index
    %1 = vector.load %arg0[%c0_1, %c0_2] : memref<16x128xbf16, #tpu.memory_space<vmem>>, vector<16x128xbf16>
    %c0_3 = arith.constant 0 : index
    %c0_4 = arith.constant 0 : index
    %c0_5 = arith.constant 0 : index
    %2 = vector.load %arg2[%c0_3, %c0_4, %c0_5] : memref<2x128x128xbf16, #tpu.memory_space<vmem>>, vector<1x128x128xbf16>
    %3 = vector.shape_cast %2 : vector<1x128x128xbf16> to vector<128x128xbf16>
    %cst = arith.constant dense<0.000000e+00> : vector<16x128xf32>
    %4 = tpu.matmul %1, %3, %cst {dimension_numbers = #tpu.dot_dimension_numbers<[1], [0], [0], [1], [0, 0, 1, 1], [], []>} : vector<16x128xbf16>, vector<128x128xbf16>, vector<16x128xf32> -> vector<16x128xf32>
    %c0_6 = arith.constant 0 : index
    %c0_7 = arith.constant 0 : index
    %c0_8 = arith.constant 0 : index
    %5 = vector.load %arg3[%c0_6, %c0_7, %c0_8] : memref<2x1x128xf32, #tpu.memory_space<vmem>>, vector<1x1x128xf32>
    %6 = vector.shape_cast %5 : vector<1x1x128xf32> to vector<1x128xf32>
    %7 = vector.broadcast %6 : vector<1x128xf32> to vector<16x128xf32>
    %8 = arith.addf %4, %7 : vector<16x128xf32>
    %cst_9 = arith.constant 0.000000e+00 : f32
    %9 = vector.broadcast %cst_9 : f32 to vector<16x128xf32>
    %10 = arith.cmpf ogt, %8, %9 : vector<16x128xf32>
    %cst_10 = arith.constant 0.000000e+00 : f32
    %11 = vector.broadcast %cst_10 : f32 to vector<16x128xf32>
    %12 = arith.minimumf %8, %11 : vector<16x128xf32>
    %13 = math.exp %12 : vector<16x128xf32>
    %cst_11 = arith.constant 1.000000e+00 : f32
    %14 = vector.broadcast %cst_11 : f32 to vector<16x128xf32>
    %15 = arith.subf %13, %14 : vector<16x128xf32>
    %16 = arith.select %10, %8, %15 : vector<16x128xi1>, vector<16x128xf32>
    %17 = arith.truncf %16 : vector<16x128xf32> to vector<16x128xbf16>
    %cst_12 = arith.constant dense<0.000000e+00> : vector<16x128xf32>
    %18 = tpu.matmul %0, %17, %cst_12 {dimension_numbers = #tpu.dot_dimension_numbers<[1], [0], [0], [1], [0, 0, 1, 1], [], []>} : vector<16x16xbf16>, vector<16x128xbf16>, vector<16x128xf32> -> vector<16x128xf32>
    %cst_13 = arith.constant dense<0.000000e+00> : vector<128xf32>
    %19 = vector.multi_reduction <add>, %18, %cst_13 [0] : vector<16x128xf32> to vector<128xf32>
    %20 = vector.shape_cast %19 : vector<128xf32> to vector<1x128xf32>
    %cst_14 = arith.constant 6.250000e-02 : f32
    %21 = vector.broadcast %cst_14 : f32 to vector<1x128xf32>
    %22 = arith.mulf %20, %21 : vector<1x128xf32>
    %c0_15 = arith.constant 0 : index
    %c0_16 = arith.constant 0 : index
    %c0_17 = arith.constant 0 : index
    %23 = vector.load %arg9[%c0_15, %c0_16, %c0_17] : memref<2x1x128xf32, #tpu.memory_space<vmem>>, vector<1x1x128xf32>
    %24 = vector.shape_cast %23 : vector<1x1x128xf32> to vector<1x128xf32>
    %25 = arith.mulf %22, %24 : vector<1x128xf32>
    %26 = vector.broadcast %25 : vector<1x128xf32> to vector<16x128xf32>
    %27 = arith.subf %18, %26 : vector<16x128xf32>
    %28 = arith.mulf %27, %27 : vector<16x128xf32>
    %cst_18 = arith.constant dense<0.000000e+00> : vector<128xf32>
    %29 = vector.multi_reduction <add>, %28, %cst_18 [0] : vector<16x128xf32> to vector<128xf32>
    %30 = vector.shape_cast %29 : vector<128xf32> to vector<1x128xf32>
    %cst_19 = arith.constant 6.250000e-02 : f32
    %31 = vector.broadcast %cst_19 : f32 to vector<1x128xf32>
    %32 = arith.mulf %30, %31 : vector<1x128xf32>
    %c0_20 = arith.constant 0 : index
    %c0_21 = arith.constant 0 : index
    %c0_22 = arith.constant 0 : index
    %33 = vector.load %arg7[%c0_20, %c0_21, %c0_22] : memref<2x1x128xf32, #tpu.memory_space<vmem>>, vector<1x1x128xf32>
    %34 = vector.shape_cast %33 : vector<1x1x128xf32> to vector<1x128xf32>
    %35 = vector.broadcast %34 : vector<1x128xf32> to vector<16x128xf32>
    %36 = arith.mulf %35, %27 : vector<16x128xf32>
    %cst_23 = arith.constant 9.99999974E-6 : f32
    %37 = vector.broadcast %cst_23 : f32 to vector<1x128xf32>
    %38 = arith.addf %32, %37 : vector<1x128xf32>
    %39 = math.rsqrt %38 : vector<1x128xf32>
    %40 = vector.broadcast %39 : vector<1x128xf32> to vector<16x128xf32>
    %41 = arith.mulf %36, %40 : vector<16x128xf32>
    %c0_24 = arith.constant 0 : index
    %c0_25 = arith.constant 0 : index
    %c0_26 = arith.constant 0 : index
    %42 = vector.load %arg8[%c0_24, %c0_25, %c0_26] : memref<2x1x128xf32, #tpu.memory_space<vmem>>, vector<1x1x128xf32>
    %43 = vector.shape_cast %42 : vector<1x1x128xf32> to vector<1x128xf32>
    %44 = vector.broadcast %43 : vector<1x128xf32> to vector<16x128xf32>
    %45 = arith.addf %41, %44 : vector<16x128xf32>
    %46 = arith.truncf %45 : vector<16x128xf32> to vector<16x128xbf16>
    %c0_27 = arith.constant 0 : index
    %c0_28 = arith.constant 0 : index
    %c0_29 = arith.constant 0 : index
    %47 = vector.load %arg4[%c0_27, %c0_28, %c0_29] : memref<2x128x128xbf16, #tpu.memory_space<vmem>>, vector<1x128x128xbf16>
    %48 = vector.shape_cast %47 : vector<1x128x128xbf16> to vector<128x128xbf16>
    %cst_30 = arith.constant dense<0.000000e+00> : vector<16x128xf32>
    %49 = tpu.matmul %46, %48, %cst_30 {dimension_numbers = #tpu.dot_dimension_numbers<[1], [0], [0], [1], [0, 0, 1, 1], [], []>} : vector<16x128xbf16>, vector<128x128xbf16>, vector<16x128xf32> -> vector<16x128xf32>
    %c0_31 = arith.constant 0 : index
    %c0_32 = arith.constant 0 : index
    %c0_33 = arith.constant 0 : index
    %50 = vector.load %arg5[%c0_31, %c0_32, %c0_33] : memref<2x128x128xbf16, #tpu.memory_space<vmem>>, vector<1x128x128xbf16>
    %51 = vector.shape_cast %50 : vector<1x128x128xbf16> to vector<128x128xbf16>
    %cst_34 = arith.constant dense<0.000000e+00> : vector<16x128xf32>
    %52 = tpu.matmul %1, %51, %cst_34 {dimension_numbers = #tpu.dot_dimension_numbers<[1], [0], [0], [1], [0, 0, 1, 1], [], []>} : vector<16x128xbf16>, vector<128x128xbf16>, vector<16x128xf32> -> vector<16x128xf32>
    %53 = arith.addf %49, %52 : vector<16x128xf32>
    %c0_35 = arith.constant 0 : index
    %c0_36 = arith.constant 0 : index
    %c0_37 = arith.constant 0 : index
    %54 = vector.load %arg6[%c0_35, %c0_36, %c0_37] : memref<2x1x128xf32, #tpu.memory_space<vmem>>, vector<1x1x128xf32>
    %55 = vector.shape_cast %54 : vector<1x1x128xf32> to vector<1x128xf32>
    %56 = vector.broadcast %55 : vector<1x128xf32> to vector<16x128xf32>
    %57 = arith.addf %53, %56 : vector<16x128xf32>
    %58 = arith.truncf %57 : vector<16x128xf32> to vector<16x128xbf16>
    %c1 = arith.constant 1 : index
    %c0_38 = arith.constant 0 : index
    %c0_39 = arith.constant 0 : index
    %59 = vector.load %arg2[%c1, %c0_38, %c0_39] : memref<2x128x128xbf16, #tpu.memory_space<vmem>>, vector<1x128x128xbf16>
    %60 = vector.shape_cast %59 : vector<1x128x128xbf16> to vector<128x128xbf16>
    %cst_40 = arith.constant dense<0.000000e+00> : vector<16x128xf32>
    %61 = tpu.matmul %58, %60, %cst_40 {dimension_numbers = #tpu.dot_dimension_numbers<[1], [0], [0], [1], [0, 0, 1, 1], [], []>} : vector<16x128xbf16>, vector<128x128xbf16>, vector<16x128xf32> -> vector<16x128xf32>
    %c1_41 = arith.constant 1 : index
    %c0_42 = arith.constant 0 : index
    %c0_43 = arith.constant 0 : index
    %62 = vector.load %arg3[%c1_41, %c0_42, %c0_43] : memref<2x1x128xf32, #tpu.memory_space<vmem>>, vector<1x1x128xf32>
    %63 = vector.shape_cast %62 : vector<1x1x128xf32> to vector<1x128xf32>
    %64 = vector.broadcast %63 : vector<1x128xf32> to vector<16x128xf32>
    %65 = arith.addf %61, %64 : vector<16x128xf32>
    %cst_44 = arith.constant 0.000000e+00 : f32
    %66 = vector.broadcast %cst_44 : f32 to vector<16x128xf32>
    %67 = arith.cmpf ogt, %65, %66 : vector<16x128xf32>
    %cst_45 = arith.constant 0.000000e+00 : f32
    %68 = vector.broadcast %cst_45 : f32 to vector<16x128xf32>
    %69 = arith.minimumf %65, %68 : vector<16x128xf32>
    %70 = math.exp %69 : vector<16x128xf32>
    %cst_46 = arith.constant 1.000000e+00 : f32
    %71 = vector.broadcast %cst_46 : f32 to vector<16x128xf32>
    %72 = arith.subf %70, %71 : vector<16x128xf32>
    %73 = arith.select %67, %65, %72 : vector<16x128xi1>, vector<16x128xf32>
    %74 = arith.truncf %73 : vector<16x128xf32> to vector<16x128xbf16>
    %cst_47 = arith.constant dense<0.000000e+00> : vector<16x128xf32>
    %75 = tpu.matmul %0, %74, %cst_47 {dimension_numbers = #tpu.dot_dimension_numbers<[1], [0], [0], [1], [0, 0, 1, 1], [], []>} : vector<16x16xbf16>, vector<16x128xbf16>, vector<16x128xf32> -> vector<16x128xf32>
    %cst_48 = arith.constant dense<0.000000e+00> : vector<128xf32>
    %76 = vector.multi_reduction <add>, %75, %cst_48 [0] : vector<16x128xf32> to vector<128xf32>
    %77 = vector.shape_cast %76 : vector<128xf32> to vector<1x128xf32>
    %cst_49 = arith.constant 6.250000e-02 : f32
    %78 = vector.broadcast %cst_49 : f32 to vector<1x128xf32>
    %79 = arith.mulf %77, %78 : vector<1x128xf32>
    %c1_50 = arith.constant 1 : index
    %c0_51 = arith.constant 0 : index
    %c0_52 = arith.constant 0 : index
    %80 = vector.load %arg9[%c1_50, %c0_51, %c0_52] : memref<2x1x128xf32, #tpu.memory_space<vmem>>, vector<1x1x128xf32>
    %81 = vector.shape_cast %80 : vector<1x1x128xf32> to vector<1x128xf32>
    %82 = arith.mulf %79, %81 : vector<1x128xf32>
    %83 = vector.broadcast %82 : vector<1x128xf32> to vector<16x128xf32>
    %84 = arith.subf %75, %83 : vector<16x128xf32>
    %85 = arith.mulf %84, %84 : vector<16x128xf32>
    %cst_53 = arith.constant dense<0.000000e+00> : vector<128xf32>
    %86 = vector.multi_reduction <add>, %85, %cst_53 [0] : vector<16x128xf32> to vector<128xf32>
    %87 = vector.shape_cast %86 : vector<128xf32> to vector<1x128xf32>
    %cst_54 = arith.constant 6.250000e-02 : f32
    %88 = vector.broadcast %cst_54 : f32 to vector<1x128xf32>
    %89 = arith.mulf %87, %88 : vector<1x128xf32>
    %c1_55 = arith.constant 1 : index
    %c0_56 = arith.constant 0 : index
    %c0_57 = arith.constant 0 : index
    %90 = vector.load %arg7[%c1_55, %c0_56, %c0_57] : memref<2x1x128xf32, #tpu.memory_space<vmem>>, vector<1x1x128xf32>
    %91 = vector.shape_cast %90 : vector<1x1x128xf32> to vector<1x128xf32>
    %92 = vector.broadcast %91 : vector<1x128xf32> to vector<16x128xf32>
    %93 = arith.mulf %92, %84 : vector<16x128xf32>
    %cst_58 = arith.constant 9.99999974E-6 : f32
    %94 = vector.broadcast %cst_58 : f32 to vector<1x128xf32>
    %95 = arith.addf %89, %94 : vector<1x128xf32>
    %96 = math.rsqrt %95 : vector<1x128xf32>
    %97 = vector.broadcast %96 : vector<1x128xf32> to vector<16x128xf32>
    %98 = arith.mulf %93, %97 : vector<16x128xf32>
    %c1_59 = arith.constant 1 : index
    %c0_60 = arith.constant 0 : index
    %c0_61 = arith.constant 0 : index
    %99 = vector.load %arg8[%c1_59, %c0_60, %c0_61] : memref<2x1x128xf32, #tpu.memory_space<vmem>>, vector<1x1x128xf32>
    %100 = vector.shape_cast %99 : vector<1x1x128xf32> to vector<1x128xf32>
    %101 = vector.broadcast %100 : vector<1x128xf32> to vector<16x128xf32>
    %102 = arith.addf %98, %101 : vector<16x128xf32>
    %103 = arith.truncf %102 : vector<16x128xf32> to vector<16x128xbf16>
    %c1_62 = arith.constant 1 : index
    %c0_63 = arith.constant 0 : index
    %c0_64 = arith.constant 0 : index
    %104 = vector.load %arg4[%c1_62, %c0_63, %c0_64] : memref<2x128x128xbf16, #tpu.memory_space<vmem>>, vector<1x128x128xbf16>
    %105 = vector.shape_cast %104 : vector<1x128x128xbf16> to vector<128x128xbf16>
    %cst_65 = arith.constant dense<0.000000e+00> : vector<16x128xf32>
    %106 = tpu.matmul %103, %105, %cst_65 {dimension_numbers = #tpu.dot_dimension_numbers<[1], [0], [0], [1], [0, 0, 1, 1], [], []>} : vector<16x128xbf16>, vector<128x128xbf16>, vector<16x128xf32> -> vector<16x128xf32>
    %c1_66 = arith.constant 1 : index
    %c0_67 = arith.constant 0 : index
    %c0_68 = arith.constant 0 : index
    %107 = vector.load %arg5[%c1_66, %c0_67, %c0_68] : memref<2x128x128xbf16, #tpu.memory_space<vmem>>, vector<1x128x128xbf16>
    %108 = vector.shape_cast %107 : vector<1x128x128xbf16> to vector<128x128xbf16>
    %cst_69 = arith.constant dense<0.000000e+00> : vector<16x128xf32>
    %109 = tpu.matmul %58, %108, %cst_69 {dimension_numbers = #tpu.dot_dimension_numbers<[1], [0], [0], [1], [0, 0, 1, 1], [], []>} : vector<16x128xbf16>, vector<128x128xbf16>, vector<16x128xf32> -> vector<16x128xf32>
    %110 = arith.addf %106, %109 : vector<16x128xf32>
    %c1_70 = arith.constant 1 : index
    %c0_71 = arith.constant 0 : index
    %c0_72 = arith.constant 0 : index
    %111 = vector.load %arg6[%c1_70, %c0_71, %c0_72] : memref<2x1x128xf32, #tpu.memory_space<vmem>>, vector<1x1x128xf32>
    %112 = vector.shape_cast %111 : vector<1x1x128xf32> to vector<1x128xf32>
    %113 = vector.broadcast %112 : vector<1x128xf32> to vector<16x128xf32>
    %114 = arith.addf %110, %113 : vector<16x128xf32>
    %115 = arith.truncf %114 : vector<16x128xf32> to vector<16x128xbf16>
    %c0_73 = arith.constant 0 : index
    %c0_74 = arith.constant 0 : index
    %116 = vector.load %arg10[%c0_73, %c0_74] : memref<128x128xbf16, #tpu.memory_space<vmem>>, vector<128x128xbf16>
    %cst_75 = arith.constant dense<0.000000e+00> : vector<16x128xf32>
    %117 = tpu.matmul %115, %116, %cst_75 {dimension_numbers = #tpu.dot_dimension_numbers<[1], [0], [0], [1], [0, 0, 1, 1], [], []>} : vector<16x128xbf16>, vector<128x128xbf16>, vector<16x128xf32> -> vector<16x128xf32>
    %c0_76 = arith.constant 0 : index
    %c0_77 = arith.constant 0 : index
    %118 = vector.load %arg11[%c0_76, %c0_77] : memref<1x128xf32, #tpu.memory_space<vmem>>, vector<1x128xf32>
    %119 = vector.broadcast %118 : vector<1x128xf32> to vector<16x128xf32>
    %120 = arith.addf %117, %119 : vector<16x128xf32>
    %c0_78 = arith.constant 0 : index
    %c0_79 = arith.constant 0 : index
    %121 = vector.load %arg12[%c0_78, %c0_79] : memref<16x128xf32, #tpu.memory_space<vmem>>, vector<16x128xf32>
    tpu.vector_store %arg12[%c0_78, %c0_79], %120 {strides = array<i32>} : memref<16x128xf32, #tpu.memory_space<vmem>>, vector<16x128xf32>,
    return
  }
}

</mosaic_0001>

<bundles_post_ra>
// kernel: graphconv_forward.1
= control target key start
LH: loop header
LB: loop body
LE: loop exit
PB: predicated region body
PF: predicated region fallthrough
CT: control target
= control target key end

     0   :  { %17 = vsyncpa [#allocation3], 0  ;;  %s1665_s0 = inlined_call_operand.hbm [shape: bf16[16,128], index: 0, kind: input, shape index: {}]   ;;  %s1666_s1 = inlined_call_operand.hbm [shape: bf16[16,16], index: 1, kind: input, shape index: {}]   ;;  %s1667_s2 = inlined_call_operand.hbm [shape: bf16[2,128,128], index: 2, kind: input, shape index: {}]   ;;  %s1668_s3 = inlined_call_operand.hbm [shape: f32[2,1,128], index: 3, kind: input, shape index: {}]   ;;  %s1669_s4 = inlined_call_operand.hbm [shape: bf16[2,128,128], index: 4, kind: input, shape index: {}]   ;;  %s1670_s5 = inlined_call_operand.hbm [shape: bf16[2,128,128], index: 5, kind: input, shape index: {}]   ;;  %s1671_s6 = inlined_call_operand.vmem [shape: f32[2,1,128], index: 6, kind: input, shape index: {}]   ;;  %s1672_s7 = inlined_call_operand.vmem [shape: f32[2,1,128], index: 7, kind: input, shape index: {}]   ;;  %s1673_s8 = inlined_call_operand.hbm [shape: f32[2,1,128], index: 8, kind: input, shape index: {}]   ;;  %s1674_s9 = inlined_call_operand.hbm [shape: f32[2,1,128], index: 9, kind: input, shape index: {}]   ;;  %s1675_s10 = inlined_call_operand.hbm [shape: bf16[128,128], index: 10, kind: input, shape index: {}]   ;;  %s1676_s11 = inlined_call_operand.vmem [shape: f32[1,128], index: 11, kind: input, shape index: {}]   ;;  %s1677_s12 = inlined_call_operand.vmem [shape: f32[16,128], index: 12, kind: output, shape index: {}]  }
   0x1   :  { %18 = vsyncpa [#allocation5], 0 }
   0x2   :  { %19 = vsyncpa [#allocation8], 0 }
   0x3   :  { %20 = vsyncpa [#allocation11], 0 }
   0x4   :  { %21 = vsyncpa [#allocation14], 0  ;;  %s39_s23 = sshll.u32 %s1666_s1, 4  ;;  %s1502_s24 = smov [#allocation4]   ;;  %s40_s23 = int_to_ptr.hbm [resolvable:$true] %s39_s23 }
   0x5   :  { %s41_s25 = sshll.u32 %s1502_s24, 4  ;;  %s65_s28 = sshll.u32 %s1668_s3, 4  ;;  %s42_s25 = int_to_ptr.vmem [resolvable:$true] %s41_s25  ;;  %s66_s28 = int_to_ptr.hbm [resolvable:$true] %s65_s28 }
   0x6   :  { %s1503_s29 = smov 64   ;;  %s1504_s30 = smov 4  }
   0x7   :  { %47 = dma.hbm_to_vmem [thread:$0]  %s40_s23, 128, %s42_s25, [#allocation5], %s1503_s29, %s1503_s29, %s1504_s30  }
   0x8   :  { %s1505_s13 = smov [#allocation7]   ;;  %s1506_s15 = smov 16  }
   0x9   :  { %s67_s14 = sshll.u32 %s1505_s13, 4  ;;  %s1507_s1 = smov 1   ;;  %s68_s14 = int_to_ptr.vmem [resolvable:$true] %s67_s14 }
   0xa   :  { %73 = dma.hbm_to_vmem [thread:$0]  %s66_s28, 32, %s68_s14, [#allocation8], %s1506_s15, %s1506_s15, %s1507_s1  }
   0xb   :  { %s91_s3 = sshll.u32 %s1670_s5, 4  ;;  %s1508_s18 = smov [#allocation10]   ;;  %s92_s3 = int_to_ptr.hbm [resolvable:$true] %s91_s3 }
   0xc   :  { %s93_s19 = sshll.u32 %s1508_s18, 4  ;;  %s121_s22 = sshll.u32 %s1674_s9, 4  ;;  %s94_s19 = int_to_ptr.vmem [resolvable:$true] %s93_s19  ;;  %s122_s22 = int_to_ptr.hbm [resolvable:$true] %s121_s22 }
   0xd   :  { %99 = dma.hbm_to_vmem [thread:$0]  %s92_s3, 2048, %s94_s19, [#allocation11], %s1503_s29, %s1503_s29, %s1504_s30  }
   0xe   :  { %s1509_s23 = smov [#allocation13]   ;;  %s26_s27 = sshll.u32 %s1665_s0, 4  ;;  %s27_s27 = int_to_ptr.hbm [resolvable:$true] %s26_s27 }
   0xf   :  { %s123_s24 = sshll.u32 %s1509_s23, 4  ;;  %s52_s9 = sshll.u32 %s1667_s2, 4  ;;  %s124_s24 = int_to_ptr.vmem [resolvable:$true] %s123_s24  ;;  %s53_s9 = int_to_ptr.hbm [resolvable:$true] %s52_s9 }
  0x10   :  { %129 = dma.hbm_to_vmem [thread:$0]  %s122_s22, 32, %s124_s24, [#allocation14], %s1506_s15, %s1506_s15, %s1507_s1  }
  0x11   :  { %s1510_s13 = smov [#allocation2]   ;;  %s1511_s16 = smov [#allocation6]  }
  0x12   :  { %s28_s14 = sshll.u32 %s1510_s13, 4  ;;  %s54_s0 = sshll.u32 %s1511_s16, 4  ;;  %s29_s14 = int_to_ptr.vmem [resolvable:$true] %s28_s14  ;;  %s55_s0 = int_to_ptr.vmem [resolvable:$true] %s54_s0 }
  0x13   :  { %34 = dma.hbm_to_vmem [thread:$0]  %s27_s27, 128, %s29_s14, [#allocation3], %s1503_s29, %s1503_s29, %s1504_s30  }
  0x14   :  { %s78_s18 = sshll.u32 %s1669_s4, 4  ;;  %s108_s20 = sshll.u32 %s1673_s8, 4  ;;  %s79_s18 = int_to_ptr.hbm [resolvable:$true] %s78_s18  ;;  %s109_s20 = int_to_ptr.hbm [resolvable:$true] %s108_s20 }
  0x15   :  { %60 = dma.hbm_to_vmem [thread:$0]  %s53_s9, 2048, %s55_s0, [#allocation5], %s1503_s29, %s1503_s29, %s1504_s30  }
  0x16   :  { %s1512_s21 = smov [#allocation9]   ;;  %s1513_s23 = smov [#allocation12]  }
  0x17   :  { %s80_s22 = sshll.u32 %s1512_s21, 4  ;;  %s110_s4 = sshll.u32 %s1513_s23, 4  ;;  %s81_s22 = int_to_ptr.vmem [resolvable:$true] %s80_s22  ;;  %s111_s4 = int_to_ptr.vmem [resolvable:$true] %s110_s4 }
  0x18   :  { %86 = dma.hbm_to_vmem [thread:$0]  %s79_s18, 2048, %s81_s22, [#allocation8], %s1503_s29, %s1503_s29, %s1504_s30  }
  0x19   :  { %s134_s26 = sshll.u32 %s1675_s10, 4  ;;  %s1514_s8 = smov [#allocation15]   ;;  %s135_s26 = int_to_ptr.hbm [resolvable:$true] %s134_s26 }
  0x1a   :  { %116 = dma.hbm_to_vmem [thread:$0]  %s109_s20, 32, %s111_s4, [#allocation11], %s1506_s15, %s1506_s15, %s1507_s1  }
  0x1b   :  { %s136_s27 = sshll.u32 %s1514_s8, 4  ;;  %s137_s27 = int_to_ptr.vmem [resolvable:$true] %s136_s27 }
  0x1c   :  { %142 = dma.hbm_to_vmem [thread:$0]  %s135_s26, 1024, %s137_s27, [#allocation14], %s1503_s29, %s1503_s29, %s1504_s30  }
  0x1d   :  { %1492 = dma.done.wait [#allocation3], 128  }
  0x1e   :  { %1493 = vsyncadd [#allocation3], 4294967168 }
  0x1f   :  { %1494 = dma.done.wait [#allocation5], 2176  }
  0x20   :  { %1495 = vsyncadd [#allocation5], 4294965120 }
  0x21   :  { %1496 = dma.done.wait [#allocation8], 2080  }
  0x22   :  { %1497 = vsyncadd [#allocation8], 4294965216 }
  0x23   :  { %1498 = dma.done.wait [#allocation11], 2080  }
  0x24   :  { %1499 = vsyncadd [#allocation11], 4294965216 }
  0x25   :  { %1500 = dma.done.wait [#allocation14], 1056  }
  0x26   :  { %1501 = vsyncadd [#allocation14], 4294966240  ;;  %v1193_v0 = vld [vmem:[#allocation6 + $0x38] sm:$0xff]  ;;  %v1192_v1 = vld [vmem:[#allocation6 + $0x30] sm:$0xff]  ;;  %vm292_vm2 = vcmask 130048  }
  0x27   :  { %260 = vmatpush.bf16.msra.mxu0 %v1193_v0  ;;  %v1191_v2 = vld [vmem:[#allocation6 + $0x28] sm:$0xff]  ;;  %v1190_v3 = vld [vmem:[#allocation6 + $0x20] sm:$0xff]  ;;  %v1189_v4 = vld [vmem:[#allocation6 + $0x18] sm:$0xff] }
  0x28   :  { %v1188_v5 = vld [vmem:[#allocation6 + $0x10] sm:$0xff]  ;;  %v1187_v6 = vld [vmem:[#allocation6 + $0x8] sm:$0xff]  ;;  %v1186_v7 = vld [vmem:[#allocation6] sm:$0xff] }
  0x29   :  { %v1634_v8 = vld [vmem:[#allocation2] sm:$0xff]  ;;  %v1255_v9 = vld [vmem:[#allocation7] ss:$0 sm:$0xff]  ;;  %v1637_v25 = vld [vmem:[#allocation4] sm:$0xff] }
  0x2a   :  { %v1209_v27 = vld [vmem:[#allocation10 + $0x38] sm:$0xff]  ;;  %v1208_v28 = vld [vmem:[#allocation10 + $0x30] sm:$0xff]  ;;  %v1207_v31 = vld [vmem:[#allocation10 + $0x28] sm:$0xff] }
  0x2b   :  { %261 = vmatpush.bf16.msra.mxu0 %v1192_v1  ;;  %439 = vmatpush.bf16.msra.mxu2 %v1209_v27  ;;  %v1201_v32 = vld [vmem:[#allocation9 + $0x38] sm:$0xff]  ;;  %v1206_v35 = vld [vmem:[#allocation10 + $0x20] sm:$0xff]  ;;  %v1200_v36 = vld [vmem:[#allocation9 + $0x30] sm:$0xff] }
  0x2c   :  { %501 = vmatpush.bf16.msra.mxu3 %v1201_v32  ;;  %v1205_v39 = vld [vmem:[#allocation10 + $0x18] sm:$0xff]  ;;  %v1199_v40 = vld [vmem:[#allocation9 + $0x28] sm:$0xff]  ;;  %v1204_v42 = vld [vmem:[#allocation10 + $0x10] sm:$0xff] }
  0x2d   :  { %v1198_v43 = vld [vmem:[#allocation9 + $0x20] sm:$0xff]  ;;  %v1203_v47 = vld [vmem:[#allocation10 + $0x8] sm:$0xff]  ;;  %v1197_v48 = vld [vmem:[#allocation9 + $0x18] sm:$0xff] }
  0x2e   :  { %v318_v45 = vld [vmem:[#allocation13] sm:$0x1]  ;;  %v1196_v52 = vld [vmem:[#allocation9 + $0x10] sm:$0xff]  ;;  %v1195_v57 = vld [vmem:[#allocation9 + $0x8] sm:$0xff] }
  0x2f   :  { %262 = vmatpush.bf16.msra.mxu0 %v1191_v2  ;;  %440 = vmatpush.bf16.msra.mxu2 %v1208_v28  ;;  %v1202_v51 = vld [vmem:[#allocation10] sm:$0xff]  ;;  %v1217_v1 = vld [vmem:[#allocation6 + $0x78] sm:$0xff] }
  0x30   :  { %502 = vmatpush.bf16.msra.mxu3 %v1200_v36  ;;  %v1194_v60 = vld [vmem:[#allocation9] sm:$0xff]  ;;  %v1233_v2 = vld [vmem:[#allocation10 + $0x78] sm:$0xff]  ;;  %592 = vmatpush.bf16.msra.mxu1 %v1217_v1  ;;  %v1228_v32 = vld [vmem:[#allocation10 + $0x50] sm:$0xff] }
  0x31   :  { %v1214_v27 = vld [vmem:[#allocation6 + $0x60] sm:$0xff] }
  0x32   :  { %v1230_v28 = vld [vmem:[#allocation10 + $0x60] sm:$0xff] }
  0x33   :  { %263 = vmatpush.bf16.msra.mxu0 %v1190_v3  ;;  %441 = vmatpush.bf16.msra.mxu2 %v1207_v31  ;;  %v1212_v31 = vld [vmem:[#allocation6 + $0x50] sm:$0xff]  ;;  %v1226_v36 = vld [vmem:[#allocation10 + $0x40] sm:$0xff] }
  0x34   :  { %503 = vmatpush.bf16.msra.mxu3 %v1199_v40  ;;  %v1258_v40 = vld [vmem:[%s1671_s6] ss:$0 sm:$0xff] }
  0x37   :  { %264 = vmatpush.bf16.msra.mxu0 %v1189_v4  ;;  %442 = vmatpush.bf16.msra.mxu2 %v1206_v35  ;;  %v1216_v4 = vld [vmem:[#allocation6 + $0x70] sm:$0xff]  ;;  %v1210_v35 = vld [vmem:[#allocation6 + $0x40] sm:$0xff] }
  0x38   :  { %504 = vmatpush.bf16.msra.mxu3 %v1198_v43  ;;  %593 = vmatpush.bf16.msra.mxu1 %v1216_v4 }
  0x3b   :  { %265 = vmatpush.bf16.msra.mxu0 %v1188_v5  ;;  %443 = vmatpush.bf16.msra.mxu2 %v1205_v39  ;;  %v1232_v5 = vld [vmem:[#allocation10 + $0x70] sm:$0xff] }
  0x3c   :  { %505 = vmatpush.bf16.msra.mxu3 %v1197_v48 }
  0x3f   :  { %266 = vmatpush.bf16.msra.mxu0 %v1187_v6  ;;  %444 = vmatpush.bf16.msra.mxu2 %v1204_v42 }
  0x40   :  { %506 = vmatpush.bf16.msra.mxu3 %v1196_v52 }
  0x43   :  { %267 = vmatpush.bf16.msra.mxu0 %v1186_v7  ;;  %445 = vmatpush.bf16.msra.mxu2 %v1203_v47  ;;  %v1259_v47 = vld [vmem:[#allocation7 + $0x1] ss:$0 sm:$0xff] }
  0x44   :  { %507 = vmatpush.bf16.msra.mxu3 %v1195_v57 }
  0x46   :  { %268 = vmatmul.bf16.vlgmr.msra.gmra.mxu0 %v1634_v8 }
  0x47   :  { %446 = vmatpush.bf16.msra.mxu2 %v1202_v51 }
  0x48   :  { %508 = vmatpush.bf16.msra.mxu3 %v1194_v60 }
  0x4a   :  { %447 = vmatmul.bf16.vlgmr.msra.gmra.mxu2 %v1634_v8 }
  0x4b   :  { %767 = vmatpush.bf16.msrb.mxu2 %v1233_v2  ;;  %v1225_v2 = vld [vmem:[#allocation9 + $0x78] sm:$0xff] }
  0x4c   :  { %829 = vmatpush.bf16.msrb.mxu3 %v1225_v2 }
  0x4f   :  { %768 = vmatpush.bf16.msrb.mxu2 %v1232_v5  ;;  %v1224_v5 = vld [vmem:[#allocation9 + $0x70] sm:$0xff] }
  0x50   :  { %830 = vmatpush.bf16.msrb.mxu3 %v1224_v5 }
  0xc3   :  { %v269_v10 = vpop.f32.mrf.mxu0 }
  0xc4   :  { %v270_v11 = vadd.f32 %v1255_v9, %v269_v10 }
  0xc6   :  { %v276_v12 = vmin.f32 %v270_v11, 0.0  ;;  %vm274_vm0 = vcmp.gt.f32.partialorder %v270_v11, 0.0 }
  0xc8   :  { %v278_v13 = vmul.f32 1.442695, %v276_v12  ;;  %v1256_v12 = vld [vmem:[%s1672_s7] ss:$0 sm:$0xff] }
  0xca   :  { %1264 = vpow2.f32 %v278_v13 }
  0xcb   :  { %v271_v14 = vpop.f32.mrf.mxu0 }
  0xcc   :  { %v272_v15 = vadd.f32 %v1255_v9, %v271_v14 }
  0xce   :  { %v277_v16 = vmin.f32 %v272_v15, 0.0  ;;  %vm275_vm1 = vcmp.gt.f32.partialorder %v272_v15, 0.0 }
  0xd0   :  { %v280_v17 = vmul.f32 1.442695, %v277_v16  ;;  %v1265_v18 = vpop.eup %1264 }
  0xd1   :  { %v980_v19 = vadd.f32 -1.0, %v1265_v18 }
  0xd2   :  { %1266 = vpow2.f32 %v280_v17  ;;  %v1257_v17 = vld [vmem:[#allocation12] ss:$0 sm:$0xff] }
  0xd3   :  { %v284_v22 = vsel %vm274_vm0, %v270_v11, %v980_v19 }
  0xd8   :  { %v1267_v20 = vpop.eup %1266 }
  0xd9   :  { %v981_v21 = vadd.f32 -1.0, %v1267_v20 }
  0xdb   :  { %v285_v23 = vsel %vm275_vm1, %v272_v15, %v981_v21 }
  0xdc   :  { %v286_v24 = vpack.c.bf16 %v285_v23, %v284_v22 }
  0xde   :  { %303 = vmatpush.bf16.msrb.mxu0 %v286_v24  ;;  %v1215_v24 = vld [vmem:[#allocation6 + $0x68] sm:$0xff] }
  0xdf   :  { %594 = vmatpush.bf16.msra.mxu1 %v1215_v24 }
  0xe1   :  { %986 = vmatmul.msk.bf16.vlgmr.msrb.gmra.mxu0 %vm292_vm2, %v1637_v25 }
  0xe3   :  { %595 = vmatpush.bf16.msra.mxu1 %v1214_v27 }
 0x15e   :  { %v305_v26 = vpop.f32.mrf.mxu0 }
 0x166   :  { %v307_v29 = vpop.f32.mrf.mxu0 }
 0x167   :  { %v310_v30 = vadd.f32 %v307_v29, %v305_v26 }
 0x169   :  { %v311_v33 = vrot.slane %v310_v30, 4 }
 0x16b   :  { %v312_v34 = vadd.f32 %v311_v33, %v310_v30  ;;  %v1229_v30 = vld [vmem:[#allocation10 + $0x58] sm:$0xff]  ;;  %v1211_v33 = vld [vmem:[#allocation6 + $0x48] sm:$0xff] }
 0x16d   :  { %v313_v37 = vrot.slane %v312_v34, 2 }
 0x16f   :  { %v314_v38 = vadd.f32 %v313_v37, %v312_v34  ;;  %v1227_v34 = vld [vmem:[#allocation10 + $0x48] sm:$0xff]  ;;  %v448_v37 = vpop.f32.mrf.mxu2 }
 0x171   :  { %v315_v41 = vrot.slane %v314_v38, 1 }
 0x173   :  { %v316_v44 = vadd.f32 %v315_v41, %v314_v38 }
 0x175   :  { %v317_v46 = vmul.f32 0.0625, %v316_v44 }
 0x177   :  { %v319_v49 = vmul.f32 %v318_v45, %v317_v46  ;;  %v450_v41 = vpop.f32.mrf.mxu2 }
 0x179   :  { %v320_v50 = vperm.slane %v319_v49, 0 }
 0x17b   :  { %v321_v53 = vsub.f32 %v305_v26, %v320_v50  ;;  %v322_v54 = vsub.f32 %v307_v29, %v320_v50  ;;  %v1231_v26 = vld [vmem:[#allocation10 + $0x68] sm:$0xff]  ;;  %v1213_v29 = vld [vmem:[#allocation6 + $0x58] sm:$0xff] }
 0x17c   :  { %769 = vmatpush.bf16.msrb.mxu2 %v1231_v26  ;;  %596 = vmatpush.bf16.msra.mxu1 %v1213_v29  ;;  %v1218_v26 = vld [vmem:[#allocation9 + $0x40] sm:$0xff] }
 0x17d   :  { %v323_v55 = vmul.f32 %v321_v53, %v321_v53  ;;  %v324_v56 = vmul.f32 %v322_v54, %v322_v54  ;;  %v338_v15 = vmul.f32 %v1256_v12, %v322_v54  ;;  %v337_v16 = vmul.f32 %v1256_v12, %v321_v53  ;;  %v1222_v12 = vld [vmem:[#allocation9 + $0x60] sm:$0xff] }
 0x17f   :  { %v325_v58 = vadd.f32 %v324_v56, %v323_v55 }
 0x180   :  { %770 = vmatpush.bf16.msrb.mxu2 %v1230_v28  ;;  %597 = vmatpush.bf16.msra.mxu1 %v1212_v31 }
 0x181   :  { %v326_v59 = vrot.slane %v325_v58, 4 }
 0x183   :  { %v327_v61 = vadd.f32 %v326_v59, %v325_v58 }
 0x184   :  { %771 = vmatpush.bf16.msrb.mxu2 %v1229_v30  ;;  %598 = vmatpush.bf16.msra.mxu1 %v1211_v33  ;;  %v1241_v30 = vld [vmem:[#allocation15 + $0x38] sm:$0xff] }
 0x185   :  { %v328_v62 = vrot.slane %v327_v61, 2 }
 0x187   :  { %v329_v63 = vadd.f32 %v328_v62, %v327_v61 }
 0x188   :  { %772 = vmatpush.bf16.msrb.mxu2 %v1228_v32  ;;  %599 = vmatpush.bf16.msra.mxu1 %v1210_v35  ;;  %v1240_v32 = vld [vmem:[#allocation15 + $0x30] sm:$0xff]  ;;  %v1239_v35 = vld [vmem:[#allocation15 + $0x28] sm:$0xff] }
 0x189   :  { %v330_v0 = vrot.slane %v329_v63, 1 }
 0x18b   :  { %v331_v3 = vadd.f32 %v330_v0, %v329_v63 }
 0x18c   :  { %773 = vmatpush.bf16.msrb.mxu2 %v1227_v34  ;;  %919 = vmatpush.bf16.msrb.mxu1 %v1241_v30 }
 0x18d   :  { %v332_v6 = vmul.f32 0.0625, %v331_v3 }
 0x18f   :  { %v339_v7 = vadd.f32 1e-05, %v332_v6 }
 0x190   :  { %774 = vmatpush.bf16.msrb.mxu2 %v1226_v36  ;;  %920 = vmatpush.bf16.msrb.mxu1 %v1240_v32  ;;  %v1238_v36 = vld [vmem:[#allocation15 + $0x20] sm:$0xff] }
 0x191   :  { %1268 = vrsqrt.f32 %v339_v7  ;;  %vm346_vm4 = vweird.f32 %v339_v7 }
 0x194   :  { %921 = vmatpush.bf16.msrb.mxu1 %v1239_v35 }
 0x197   :  { %v1269_v8 = vpop.eup %1268 }
 0x198   :  { %v341_v9 = vmul.f32 %v1269_v8, %v339_v7  ;;  %vm347_vm3 = vweird.f32 %v1269_v8  ;;  %922 = vmatpush.bf16.msrb.mxu1 %v1238_v36 }
 0x199   :  { %vm348_vm5 = vmor %vm346_vm4, %vm347_vm3 }
 0x19a   :  { %v342_v10 = vmul.f32 %v1269_v8, %v341_v9 }
 0x19c   :  { %v343_v11 = vmul.f32 0.5, %v342_v10 }
 0x19e   :  { %v344_v13 = vsub.f32 1.5, %v343_v11  ;;  %v642_v11 = vld [vmem:[#allocation13 + $0x1] sm:$0x1] }
 0x1a0   :  { %v345_v14 = vmul.f32 %v1269_v8, %v344_v13 }
 0x1a2   :  { %v349_v18 = vsel %vm348_vm5, %v1269_v8, %v345_v14  ;;  %v1223_v8 = vld [vmem:[#allocation9 + $0x68] sm:$0xff]  ;;  %v1221_v14 = vld [vmem:[#allocation9 + $0x58] sm:$0xff] }
 0x1a3   :  { %v350_v19 = vmul.f32 %v349_v18, %v337_v16  ;;  %v351_v20 = vmul.f32 %v349_v18, %v338_v15  ;;  %831 = vmatpush.bf16.msrb.mxu3 %v1223_v8  ;;  %v1220_v18 = vld [vmem:[#allocation9 + $0x50] sm:$0xff] }
 0x1a5   :  { %v356_v21 = vadd.f32 %v1257_v17, %v350_v19  ;;  %v357_v22 = vadd.f32 %v1257_v17, %v351_v20 }
 0x1a7   :  { %v358_v23 = vpack.c.bf16 %v357_v22, %v356_v21  ;;  %832 = vmatpush.bf16.msrb.mxu3 %v1222_v12  ;;  %v1219_v22 = vld [vmem:[#allocation9 + $0x48] sm:$0xff] }
 0x1a9   :  { %509 = vmatmul.bf16.vlgmr.msra.gmra.mxu3 %v358_v23 }
 0x1ab   :  { %833 = vmatpush.bf16.msrb.mxu3 %v1221_v14 }
 0x1af   :  { %834 = vmatpush.bf16.msrb.mxu3 %v1220_v18 }
 0x1b3   :  { %835 = vmatpush.bf16.msrb.mxu3 %v1219_v22 }
 0x1b7   :  { %836 = vmatpush.bf16.msrb.mxu3 %v1218_v26 }
 0x22c   :  { %v510_v38 = vpop.f32.mrf.mxu3 }
 0x22d   :  { %v511_v39 = vadd.f32 %v510_v38, %v448_v37 }
 0x22f   :  { %v519_v44 = vadd.f32 %v1258_v40, %v511_v39 }
 0x234   :  { %v512_v42 = vpop.f32.mrf.mxu3 }
 0x235   :  { %v513_v43 = vadd.f32 %v512_v42, %v450_v41  ;;  %v1260_v41 = vld [vmem:[%s1672_s7 + $0x1] ss:$0 sm:$0xff] }
 0x237   :  { %v520_v45 = vadd.f32 %v1258_v40, %v513_v43 }
 0x239   :  { %v521_v46 = vpack.c.bf16 %v520_v45, %v519_v44 }
 0x23b   :  { %600 = vmatmul.bf16.vlgmr.msra.gmra.mxu1 %v521_v46  ;;  %775 = vmatmul.bf16.vlgmr.msrb.gmra.mxu2 %v521_v46  ;;  %v1261_v46 = vld [vmem:[#allocation12 + $0x1] ss:$0 sm:$0xff] }
 0x2b8   :  { %v601_v48 = vpop.f32.mrf.mxu1 }
 0x2b9   :  { %v602_v49 = vadd.f32 %v1259_v47, %v601_v48 }
 0x2bb   :  { %v608_v50 = vmin.f32 %v602_v49, 0.0  ;;  %vm606_vm6 = vcmp.gt.f32.partialorder %v602_v49, 0.0 }
 0x2bd   :  { %v610_v51 = vmul.f32 1.442695, %v608_v50 }
 0x2bf   :  { %1270 = vpow2.f32 %v610_v51 }
 0x2c0   :  { %v603_v52 = vpop.f32.mrf.mxu1 }
 0x2c1   :  { %v604_v53 = vadd.f32 %v1259_v47, %v603_v52 }
 0x2c3   :  { %v609_v54 = vmin.f32 %v604_v53, 0.0  ;;  %vm607_vm7 = vcmp.gt.f32.partialorder %v604_v53, 0.0 }
 0x2c5   :  { %v612_v55 = vmul.f32 1.442695, %v609_v54  ;;  %v1271_v56 = vpop.eup %1270  ;;  %v1236_v54 = vld [vmem:[#allocation15 + $0x10] sm:$0xff] }
 0x2c6   :  { %v1083_v57 = vadd.f32 -1.0, %v1271_v56  ;;  %v1234_v56 = vld [vmem:[#allocation15] sm:$0xff] }
 0x2c7   :  { %1272 = vpow2.f32 %v612_v55  ;;  %v1235_v55 = vld [vmem:[#allocation15 + $0x8] sm:$0xff] }
 0x2c8   :  { %v616_v60 = vsel %vm606_vm6, %v602_v49, %v1083_v57  ;;  %v776_v57 = vpop.f32.mrf.mxu2 }
 0x2cd   :  { %v1273_v58 = vpop.eup %1272 }
 0x2ce   :  { %v1084_v59 = vadd.f32 -1.0, %v1273_v58 }
 0x2d0   :  { %v617_v61 = vsel %vm607_vm7, %v604_v53, %v1084_v59  ;;  %v1237_v53 = vld [vmem:[#allocation15 + $0x18] sm:$0xff] }
 0x2d1   :  { %v618_v62 = vpack.c.bf16 %v617_v61, %v616_v60  ;;  %923 = vmatpush.bf16.msrb.mxu1 %v1237_v53  ;;  %v1262_v60 = vld [vmem:[%s1671_s6 + $0x1] ss:$0 sm:$0xff]  ;;  %v778_v61 = vpop.f32.mrf.mxu2 }
 0x2d3   :  { %626 = vmatpush.bf16.msra.mxu0 %v618_v62 }
 0x2d5   :  { %924 = vmatpush.bf16.msrb.mxu1 %v1236_v54 }
 0x2d6   :  { %1085 = vmatmul.msk.bf16.vlgmr.msra.gmra.mxu0 %vm292_vm2, %v1637_v25 }
 0x2d9   :  { %925 = vmatpush.bf16.msrb.mxu1 %v1235_v55 }
 0x2dd   :  { %926 = vmatpush.bf16.msrb.mxu1 %v1234_v56 }
 0x353   :  { %v628_v63 = vpop.f32.mrf.mxu0 }
 0x35b   :  { %v630_v0 = vpop.f32.mrf.mxu0 }
 0x35c   :  { %v633_v1 = vadd.f32 %v630_v0, %v628_v63 }
 0x35e   :  { %v634_v3 = vrot.slane %v633_v1, 4 }
 0x360   :  { %v635_v4 = vadd.f32 %v634_v3, %v633_v1  ;;  %v1263_v3 = vld [vmem:[%s1676_s11] ss:$0 sm:$0xff] }
 0x362   :  { %v636_v6 = vrot.slane %v635_v4, 2 }
 0x364   :  { %v637_v7 = vadd.f32 %v636_v6, %v635_v4 }
 0x366   :  { %v638_v9 = vrot.slane %v637_v7, 1 }
 0x368   :  { %v639_v10 = vadd.f32 %v638_v9, %v637_v7 }
 0x36a   :  { %v640_v13 = vmul.f32 0.0625, %v639_v10 }
 0x36c   :  { %v643_v25 = vmul.f32 %v642_v11, %v640_v13 }
 0x36e   :  { %v644_v15 = vperm.slane %v643_v25, 0 }
 0x370   :  { %v645_v16 = vsub.f32 %v628_v63, %v644_v15  ;;  %v646_v17 = vsub.f32 %v630_v0, %v644_v15 }
 0x372   :  { %v647_v19 = vmul.f32 %v645_v16, %v645_v16  ;;  %v648_v20 = vmul.f32 %v646_v17, %v646_v17  ;;  %v662_v44 = vmul.f32 %v1260_v41, %v645_v16  ;;  %v663_v45 = vmul.f32 %v1260_v41, %v646_v17 }
 0x374   :  { %v649_v21 = vadd.f32 %v648_v20, %v647_v19 }
 0x376   :  { %v650_v23 = vrot.slane %v649_v21, 4 }
 0x378   :  { %v651_v24 = vadd.f32 %v650_v23, %v649_v21 }
 0x37a   :  { %v652_v27 = vrot.slane %v651_v24, 2 }
 0x37c   :  { %v653_v28 = vadd.f32 %v652_v27, %v651_v24 }
 0x37e   :  { %v654_v29 = vrot.slane %v653_v28, 1 }
 0x380   :  { %v655_v31 = vadd.f32 %v654_v29, %v653_v28 }
 0x382   :  { %v656_v33 = vmul.f32 0.0625, %v655_v31 }
 0x384   :  { %v664_v34 = vadd.f32 1e-05, %v656_v33 }
 0x386   :  { %1274 = vrsqrt.f32 %v664_v34  ;;  %vm671_vm9 = vweird.f32 %v664_v34 }
 0x38c   :  { %v1275_v37 = vpop.eup %1274 }
 0x38d   :  { %v666_v38 = vmul.f32 %v1275_v37, %v664_v34  ;;  %vm672_vm8 = vweird.f32 %v1275_v37 }
 0x38e   :  { %vm673_vm10 = vmor %vm671_vm9, %vm672_vm8 }
 0x38f   :  { %v667_v39 = vmul.f32 %v1275_v37, %v666_v38 }
 0x391   :  { %v668_v40 = vmul.f32 0.5, %v667_v39 }
 0x393   :  { %v669_v42 = vsub.f32 1.5, %v668_v40 }
 0x395   :  { %v670_v43 = vmul.f32 %v1275_v37, %v669_v42 }
 0x397   :  { %v674_v47 = vsel %vm673_vm10, %v1275_v37, %v670_v43 }
 0x398   :  { %v675_v48 = vmul.f32 %v674_v47, %v662_v44  ;;  %v676_v49 = vmul.f32 %v674_v47, %v663_v45 }
 0x39a   :  { %v682_v50 = vadd.f32 %v1261_v46, %v675_v48  ;;  %v683_v51 = vadd.f32 %v1261_v46, %v676_v49 }
 0x39c   :  { %v684_v52 = vpack.c.bf16 %v683_v51, %v682_v50 }
 0x39e   :  { %837 = vmatmul.bf16.vlgmr.msrb.gmra.mxu3 %v684_v52 }
 0x421   :  { %v838_v58 = vpop.f32.mrf.mxu3 }
 0x422   :  { %v839_v59 = vadd.f32 %v838_v58, %v776_v57 }
 0x424   :  { %v848_v0 = vadd.f32 %v1262_v60, %v839_v59 }
 0x429   :  { %v840_v62 = vpop.f32.mrf.mxu3 }
 0x42a   :  { %v841_v63 = vadd.f32 %v840_v62, %v778_v61 }
 0x42c   :  { %v849_v1 = vadd.f32 %v1262_v60, %v841_v63 }
 0x42e   :  { %v850_v2 = vpack.c.bf16 %v849_v1, %v848_v0 }
 0x430   :  { %927 = vmatmul.bf16.vlgmr.msrb.gmra.mxu1 %v850_v2 }
 0x4ad   :  { %v928_v4 = vpop.f32.mrf.mxu1 }
 0x4ae   :  { %v929_v5 = vadd.f32 %v1263_v3, %v928_v4 }
 0x4b0   :  { %933 = vst [vmem:[%s1677_s12] sm:$0xff] %v929_v5 }
 0x4b5   :  { %v930_v6 = vpop.f32.mrf.mxu1 }
 0x4b6   :  { %v931_v7 = vadd.f32 %v1263_v3, %v930_v6 }
 0x4b8   :  { %934 = vst [vmem:[%s1677_s12 + $0x8] sm:$0xff] %v931_v7 }
 0x4b9   :  { %939 = vsyncpa [#allocation3], 1 }
 0x4ba   :  { %940 = vsyncpa [#allocation5], 1 }
 0x4bb   :  { %941 = vsyncpa [#allocation8], 1 }
 0x4bc   :  { %942 = vsyncpa [#allocation11], 1 }
 0x4bd   :  { %943 = vsyncpa [#allocation14], 1 }

</bundles_post_ra>
